<compile_context>
chip_gen: v6e
topology: v6e:2x2x1
jax: 0.10.0
libtpu: 0.0.40
codegen_flags: <defaults>
</compile_context>

<pallas_src>
import jax
import jax.numpy as jnp
from jax.experimental import pallas as pl
from jax.experimental.pallas import tpu as pltpu


def _attention_kernel(ctx_ref, asp_ref, wc_ref, wa_ref, v_ref, out_ref):
    # ctx_ref: (Bt, TL1, D), asp_ref: (Bt, L2, D)
    # wc_ref/wa_ref: (D, D) pre-transposed (in, out), v_ref: (1, D)
    Bt, TL1, D = ctx_ref.shape
    L2 = asp_ref.shape[1]

    wc = wc_ref[...]                      # (D, D)
    wa = wa_ref[...]                      # (D, D)
    v = v_ref[...]                        # (1, D)

    ctx = ctx_ref[...]                    # (Bt, TL1, D)
    asp = asp_ref[...]                    # (Bt, L2, D)

    # Merged projections: fold the batch tile into the matmul M dimension so the MXU
    # sees (Bt*TL1, D) / (Bt*L2, D) row blocks instead of tiny per-batch matmuls.
    cW = jnp.dot(ctx.reshape(Bt * TL1, D), wc,
                 preferred_element_type=jnp.float32).reshape(Bt, TL1, D)
    aW = jnp.dot(asp.reshape(Bt * L2, D), wa,
                 preferred_element_type=jnp.float32).reshape(Bt, L2, D)

    # Per-batch additive attention. Bt is a small static tile, so this Python loop
    # fully unrolls and all intermediates stay 3-D: (TL1, L2, D).
    for b in range(Bt):
        # s[i, j, :] = tanh(cW[i] + aW[j])   (EUP tanh)
        s = jnp.tanh(cW[b][:, None, :] + aW[b][None, :, :])          # (TL1, L2, D)

        # V projection as VPU multiply + lane reduction (no (.,D)@(D,1) matvec,
        # no reshape copy of the 3-D tensor).
        logits = jnp.sum(s * v, axis=-1)                             # (TL1, L2)

        # softmax over the aspect axis (dim=2 in the PyTorch code).
        m = jnp.max(logits, axis=-1, keepdims=True)
        e = jnp.exp(logits - m)
        denom = jnp.sum(e, axis=-1, keepdims=True)
        alpha = e * pl.reciprocal(denom, approx=True)                # f32, (TL1, L2)

        # out = alpha @ aspect  -> (TL1, D); keep alpha in f32.
        out_b = jnp.dot(alpha, asp[b].astype(jnp.float32),
                        preferred_element_type=jnp.float32)
        out_ref[b] = out_b.astype(out_ref.dtype)


def _largest_divisor_leq(n, cap):
    cap = max(1, min(n, cap))
    for d in range(cap, 0, -1):
        if n % d == 0:
            return d
    return 1


def attention_pallas(context, aspect, wc_t, wa_t, v_row, *,
                     batch_tile=None, l1_tile=None):
    """context: (B, L1, D), aspect: (B, L2, D)
       wc_t, wa_t: (D, D) = torch Linear weight transposed (in, out);
       v_row: (1, D) = torch V.weight as a row."""
    B, L1, D = context.shape
    _, L2, _ = aspect.shape

    # ---- tile selection (keeps all per-step buffers well inside the scoped VMEM
    # budget on every generation; BlockSpec double-buffers inputs, so budgets are
    # conservative) ----
    if batch_tile is None:
        per_batch_bytes = (2 * L1 + 2 * L2) * D * 4          # ctx + out + asp blocks
        cap = max(1, min(8, (2 << 20) // max(per_batch_bytes, 1)))
        batch_tile = _largest_divisor_leq(B, cap)
    if l1_tile is None:
        per_row_bytes = batch_tile * L2 * D * 4               # tanh intermediate / row
        cap = max(1, (8 << 20) // max(per_row_bytes, 1))
        if L1 <= cap:
            l1_tile = L1                                      # full dim: always legal
        else:
            cands = [t for t in range(8, min(cap, L1) + 1, 8) if L1 % t == 0]
            l1_tile = max(cands) if cands else L1

    grid = (B // batch_tile, L1 // l1_tile)

    return pl.pallas_call(
        _attention_kernel,
        out_shape=jax.ShapeDtypeStruct((B, L1, D), context.dtype),
        grid_spec=pltpu.PrefetchScalarGridSpec(
            num_scalar_prefetch=0,
            grid=grid,
            in_specs=[
                pl.BlockSpec((batch_tile, l1_tile, D), lambda bb, lt: (bb, lt, 0)),
                pl.BlockSpec((batch_tile, L2, D), lambda bb, lt: (bb, 0, 0)),
                # Weights: constant index -> not re-DMA'd across the grid.
                pl.BlockSpec((D, D), lambda bb, lt: (0, 0)),
                pl.BlockSpec((D, D), lambda bb, lt: (0, 0)),
                pl.BlockSpec((1, D), lambda bb, lt: (0, 0)),
            ],
            out_specs=pl.BlockSpec((batch_tile, l1_tile, D),
                                   lambda bb, lt: (bb, lt, 0)),
        ),
        compiler_params=pltpu.CompilerParams(
            # Both axes independent -> shard across v7x's 2 TensorCores too.
            dimension_semantics=("parallel", "parallel"),
            # Explicit budget that is valid on v5e/v6e (128 MiB phys) and v7x (64 MiB
            # phys); tile chooser above keeps per-step usage well below this.
            vmem_limit_bytes=32 * 1024 * 1024,
        ),
    )(context, aspect, wc_t, wa_t, v_row)


def attention_ref(context, aspect, wc_t, wa_t, v_row):
    """Pure-JAX reference mirroring the PyTorch forward (exact softmax)."""
    cW = context @ wc_t                                   # (B, L1, D)
    aW = aspect @ wa_t                                    # (B, L2, D)
    s = jnp.tanh(cW[:, :, None, :] + aW[:, None, :, :])   # (B, L1, L2, D)
    logits = jnp.squeeze(s @ v_row.T, -1)                 # (B, L1, L2)
    alpha = jax.nn.softmax(logits, axis=2)
    return jnp.einsum("bij,bjd->bid", alpha, aspect)      # (B, L1, D)


if __name__ == "__main__":
    key = jax.random.PRNGKey(0)
    B, L1, L2, D = 2, 8, 8, 32

    k_ctx, k_asp, k_wc, k_wa, k_v = jax.random.split(key, 5)

    context = jax.random.normal(k_ctx, (B, L1, D), dtype=jnp.float32)
    aspect = jax.random.normal(k_asp, (B, L2, D), dtype=jnp.float32)

    # Deterministic parameter init (mimic nn.Linear uniform(-1/sqrt(D), 1/sqrt(D)));
    # Wc/Wa stored pre-transposed as (in, out); V stored as a (1, D) row.
    bound = 1.0 / (D ** 0.5)
    wc_t = jax.random.uniform(k_wc, (D, D), jnp.float32, -bound, bound)
    wa_t = jax.random.uniform(k_wa, (D, D), jnp.float32, -bound, bound)
    v_row = jax.random.uniform(k_v, (1, D), jnp.float32, -bound, bound)

    out = attention_pallas(context, aspect, wc_t, wa_t, v_row)
    out = jax.block_until_ready(out)

    ref = attention_ref(context, aspect, wc_t, wa_t, v_row)
    assert out.shape == (B, L1, D)
    # Tolerance accounts for the approximate (EUP) reciprocal in the softmax
    # normalizer (~2^-12 relative); everything else is exact f32.
    err = jnp.max(jnp.abs(out - ref))
    assert jnp.allclose(out, ref, atol=5e-3, rtol=5e-3), f"mismatch vs reference: {err}"

    print("KERNEL_OK")
</pallas_src>

<mosaic_0001>
module attributes {stable_mosaic.version = 11 : i64} {
  func.func @_attention_kernel(%arg0: i32, %arg1: i32, %arg2: memref<2x8x32xf32, #tpu.memory_space<vmem>>, %arg3: memref<2x8x32xf32, #tpu.memory_space<vmem>>, %arg4: memref<32x32xf32, #tpu.memory_space<vmem>>, %arg5: memref<32x32xf32, #tpu.memory_space<vmem>>, %arg6: memref<1x32xf32, #tpu.memory_space<vmem>>, %arg7: memref<2x8x32xf32, #tpu.memory_space<vmem>>) attributes {dimension_semantics = [#tpu.dimension_semantics<parallel>, #tpu.dimension_semantics<parallel>], iteration_bounds = array<i64: 1, 1>, scalar_prefetch = 0 : i64, scratch_operands = 0 : i64, tpu.core_type = #tpu.core_type<tc>, window_params = [{transform_indices = @transform_0, window_bounds = array<i64: 2, 8, 32>}, {transform_indices = @transform_1, window_bounds = array<i64: 2, 8, 32>}, {pipeline_mode = #tpu.pipeline_mode<synchronous>, transform_indices = @transform_2, window_bounds = array<i64: 32, 32>}, {pipeline_mode = #tpu.pipeline_mode<synchronous>, transform_indices = @transform_3, window_bounds = array<i64: 32, 32>}, {pipeline_mode = #tpu.pipeline_mode<synchronous>, transform_indices = @transform_4, window_bounds = array<i64: 1, 32>}, {transform_indices = @transform_5, window_bounds = array<i64: 2, 8, 32>}]} {
    %c0 = arith.constant 0 : index
    %c0_0 = arith.constant 0 : index
    %0 = vector.load %arg4[%c0, %c0_0] : memref<32x32xf32, #tpu.memory_space<vmem>>, vector<32x32xf32>
    %c0_1 = arith.constant 0 : index
    %c0_2 = arith.constant 0 : index
    %1 = vector.load %arg5[%c0_1, %c0_2] : memref<32x32xf32, #tpu.memory_space<vmem>>, vector<32x32xf32>
    %c0_3 = arith.constant 0 : index
    %c0_4 = arith.constant 0 : index
    %2 = vector.load %arg6[%c0_3, %c0_4] : memref<1x32xf32, #tpu.memory_space<vmem>>, vector<1x32xf32>
    %c0_5 = arith.constant 0 : index
    %c0_6 = arith.constant 0 : index
    %c0_7 = arith.constant 0 : index
    %3 = vector.load %arg2[%c0_5, %c0_6, %c0_7] : memref<2x8x32xf32, #tpu.memory_space<vmem>>, vector<2x8x32xf32>
    %c0_8 = arith.constant 0 : index
    %c0_9 = arith.constant 0 : index
    %c0_10 = arith.constant 0 : index
    %4 = vector.load %arg3[%c0_8, %c0_9, %c0_10] : memref<2x8x32xf32, #tpu.memory_space<vmem>>, vector<2x8x32xf32>
    %5 = vector.shape_cast %3 : vector<2x8x32xf32> to vector<16x32xf32>
    %cst = arith.constant dense<0.000000e+00> : vector<16x32xf32>
    %6 = tpu.matmul %5, %0, %cst {dimension_numbers = #tpu.dot_dimension_numbers<[1], [0], [0], [1], [0, 0, 1, 1], [], []>} : vector<16x32xf32>, vector<32x32xf32>, vector<16x32xf32> -> vector<16x32xf32>
    %7 = vector.shape_cast %6 : vector<16x32xf32> to vector<2x8x32xf32>
    %8 = vector.shape_cast %4 : vector<2x8x32xf32> to vector<16x32xf32>
    %cst_11 = arith.constant dense<0.000000e+00> : vector<16x32xf32>
    %9 = tpu.matmul %8, %1, %cst_11 {dimension_numbers = #tpu.dot_dimension_numbers<[1], [0], [0], [1], [0, 0, 1, 1], [], []>} : vector<16x32xf32>, vector<32x32xf32>, vector<16x32xf32> -> vector<16x32xf32>
    %10 = vector.shape_cast %9 : vector<16x32xf32> to vector<2x8x32xf32>
    %11 = vector.extract_strided_slice %7 {offsets = [0, 0, 0], sizes = [1, 8, 32], strides = [1, 1, 1]} : vector<2x8x32xf32> to vector<1x8x32xf32>
    %12 = vector.shape_cast %11 : vector<1x8x32xf32> to vector<8x32xf32>
    %13 = vector.shape_cast %12 : vector<8x32xf32> to vector<8x1x32xf32>
    %14 = vector.extract_strided_slice %10 {offsets = [0, 0, 0], sizes = [1, 8, 32], strides = [1, 1, 1]} : vector<2x8x32xf32> to vector<1x8x32xf32>
    %15 = vector.shape_cast %14 : vector<1x8x32xf32> to vector<8x32xf32>
    %16 = vector.shape_cast %15 : vector<8x32xf32> to vector<1x8x32xf32>
    %17 = vector.broadcast %13 : vector<8x1x32xf32> to vector<8x8x32xf32>
    %18 = vector.broadcast %16 : vector<1x8x32xf32> to vector<8x8x32xf32>
    %19 = arith.addf %17, %18 : vector<8x8x32xf32>
    %20 = math.tanh %19 : vector<8x8x32xf32>
    %21 = vector.shape_cast %2 : vector<1x32xf32> to vector<1x1x32xf32>
    %22 = vector.broadcast %21 : vector<1x1x32xf32> to vector<8x8x32xf32>
    %23 = arith.mulf %20, %22 : vector<8x8x32xf32>
    %cst_12 = arith.constant dense<0.000000e+00> : vector<8x8xf32>
    %24 = vector.multi_reduction <add>, %23, %cst_12 [2] : vector<8x8x32xf32> to vector<8x8xf32>
    %cst_13 = arith.constant dense<0xFF800000> : vector<8xf32>
    %25 = vector.multi_reduction <maximumf>, %24, %cst_13 [1] : vector<8x8xf32> to vector<8xf32>
    %26 = vector.shape_cast %25 : vector<8xf32> to vector<8x1xf32>
    %27 = vector.broadcast %26 : vector<8x1xf32> to vector<8x8xf32>
    %28 = arith.subf %24, %27 : vector<8x8xf32>
    %29 = math.exp %28 : vector<8x8xf32>
    %cst_14 = arith.constant dense<0.000000e+00> : vector<8xf32>
    %30 = vector.multi_reduction <add>, %29, %cst_14 [1] : vector<8x8xf32> to vector<8xf32>
    %31 = vector.shape_cast %30 : vector<8xf32> to vector<8x1xf32>
    %32 = tpu.reciprocal %31 {approx = true} : vector<8x1xf32> -> vector<8x1xf32>
    %33 = vector.broadcast %32 : vector<8x1xf32> to vector<8x8xf32>
    %34 = arith.mulf %29, %33 : vector<8x8xf32>
    %35 = vector.extract_strided_slice %4 {offsets = [0, 0, 0], sizes = [1, 8, 32], strides = [1, 1, 1]} : vector<2x8x32xf32> to vector<1x8x32xf32>
    %36 = vector.shape_cast %35 : vector<1x8x32xf32> to vector<8x32xf32>
    %cst_15 = arith.constant dense<0.000000e+00> : vector<8x32xf32>
    %37 = tpu.matmul %34, %36, %cst_15 {dimension_numbers = #tpu.dot_dimension_numbers<[1], [0], [0], [1], [0, 0, 1, 1], [], []>} : vector<8x8xf32>, vector<8x32xf32>, vector<8x32xf32> -> vector<8x32xf32>
    %c0_16 = arith.constant 0 : index
    %c0_17 = arith.constant 0 : index
    %c0_18 = arith.constant 0 : index
    %38 = vector.load %arg7[%c0_16, %c0_17, %c0_18] : memref<2x8x32xf32, #tpu.memory_space<vmem>>, vector<1x8x32xf32>
    %39 = vector.shape_cast %38 : vector<1x8x32xf32> to vector<8x32xf32>
    %40 = vector.shape_cast %37 : vector<8x32xf32> to vector<1x8x32xf32>
    tpu.vector_store %arg7[%c0_16, %c0_17, %c0_18], %40 {strides = array<i32>} : memref<2x8x32xf32, #tpu.memory_space<vmem>>, vector<1x8x32xf32>,
    %41 = vector.extract_strided_slice %7 {offsets = [1, 0, 0], sizes = [1, 8, 32], strides = [1, 1, 1]} : vector<2x8x32xf32> to vector<1x8x32xf32>
    %42 = vector.shape_cast %41 : vector<1x8x32xf32> to vector<8x32xf32>
    %43 = vector.shape_cast %42 : vector<8x32xf32> to vector<8x1x32xf32>
    %44 = vector.extract_strided_slice %10 {offsets = [1, 0, 0], sizes = [1, 8, 32], strides = [1, 1, 1]} : vector<2x8x32xf32> to vector<1x8x32xf32>
    %45 = vector.shape_cast %44 : vector<1x8x32xf32> to vector<8x32xf32>
    %46 = vector.shape_cast %45 : vector<8x32xf32> to vector<1x8x32xf32>
    %47 = vector.broadcast %43 : vector<8x1x32xf32> to vector<8x8x32xf32>
    %48 = vector.broadcast %46 : vector<1x8x32xf32> to vector<8x8x32xf32>
    %49 = arith.addf %47, %48 : vector<8x8x32xf32>
    %50 = math.tanh %49 : vector<8x8x32xf32>
    %51 = vector.shape_cast %2 : vector<1x32xf32> to vector<1x1x32xf32>
    %52 = vector.broadcast %51 : vector<1x1x32xf32> to vector<8x8x32xf32>
    %53 = arith.mulf %50, %52 : vector<8x8x32xf32>
    %cst_19 = arith.constant dense<0.000000e+00> : vector<8x8xf32>
    %54 = vector.multi_reduction <add>, %53, %cst_19 [2] : vector<8x8x32xf32> to vector<8x8xf32>
    %cst_20 = arith.constant dense<0xFF800000> : vector<8xf32>
    %55 = vector.multi_reduction <maximumf>, %54, %cst_20 [1] : vector<8x8xf32> to vector<8xf32>
    %56 = vector.shape_cast %55 : vector<8xf32> to vector<8x1xf32>
    %57 = vector.broadcast %56 : vector<8x1xf32> to vector<8x8xf32>
    %58 = arith.subf %54, %57 : vector<8x8xf32>
    %59 = math.exp %58 : vector<8x8xf32>
    %cst_21 = arith.constant dense<0.000000e+00> : vector<8xf32>
    %60 = vector.multi_reduction <add>, %59, %cst_21 [1] : vector<8x8xf32> to vector<8xf32>
    %61 = vector.shape_cast %60 : vector<8xf32> to vector<8x1xf32>
    %62 = tpu.reciprocal %61 {approx = true} : vector<8x1xf32> -> vector<8x1xf32>
    %63 = vector.broadcast %62 : vector<8x1xf32> to vector<8x8xf32>
    %64 = arith.mulf %59, %63 : vector<8x8xf32>
    %65 = vector.extract_strided_slice %4 {offsets = [1, 0, 0], sizes = [1, 8, 32], strides = [1, 1, 1]} : vector<2x8x32xf32> to vector<1x8x32xf32>
    %66 = vector.shape_cast %65 : vector<1x8x32xf32> to vector<8x32xf32>
    %cst_22 = arith.constant dense<0.000000e+00> : vector<8x32xf32>
    %67 = tpu.matmul %64, %66, %cst_22 {dimension_numbers = #tpu.dot_dimension_numbers<[1], [0], [0], [1], [0, 0, 1, 1], [], []>} : vector<8x8xf32>, vector<8x32xf32>, vector<8x32xf32> -> vector<8x32xf32>
    %c1 = arith.constant 1 : index
    %c0_23 = arith.constant 0 : index
    %c0_24 = arith.constant 0 : index
    %68 = vector.load %arg7[%c1, %c0_23, %c0_24] : memref<2x8x32xf32, #tpu.memory_space<vmem>>, vector<1x8x32xf32>
    %69 = vector.shape_cast %68 : vector<1x8x32xf32> to vector<8x32xf32>
    %70 = vector.shape_cast %67 : vector<8x32xf32> to vector<1x8x32xf32>
    tpu.vector_store %arg7[%c1, %c0_23, %c0_24], %70 {strides = array<i32>} : memref<2x8x32xf32, #tpu.memory_space<vmem>>, vector<1x8x32xf32>,
    return
  }
  func.func @transform_0(%arg0: i32, %arg1: i32) -> (i32, i32, i32) {
    %c0_i32 = arith.constant 0 : i32
    %c0_i32_0 = arith.constant 0 : i32
    return %arg0, %arg1, %c0_i32 : i32, i32, i32
  }
  func.func @transform_1(%arg0: i32, %arg1: i32) -> (i32, i32, i32) {
    %c0_i32 = arith.constant 0 : i32
    %c0_i32_0 = arith.constant 0 : i32
    %c0_i32_1 = arith.constant 0 : i32
    return %arg0, %c0_i32, %c0_i32_0 : i32, i32, i32
  }
  func.func @transform_2(%arg0: i32, %arg1: i32) -> (i32, i32) {
    %c0_i32 = arith.constant 0 : i32
    %c0_i32_0 = arith.constant 0 : i32
    %c0_i32_1 = arith.constant 0 : i32
    return %c0_i32, %c0_i32_0 : i32, i32
  }
  func.func @transform_3(%arg0: i32, %arg1: i32) -> (i32, i32) {
    %c0_i32 = arith.constant 0 : i32
    %c0_i32_0 = arith.constant 0 : i32
    %c0_i32_1 = arith.constant 0 : i32
    return %c0_i32, %c0_i32_0 : i32, i32
  }
  func.func @transform_4(%arg0: i32, %arg1: i32) -> (i32, i32) {
    %c0_i32 = arith.constant 0 : i32
    %c0_i32_0 = arith.constant 0 : i32
    %c0_i32_1 = arith.constant 0 : i32
    return %c0_i32, %c0_i32_0 : i32, i32
  }
  func.func @transform_5(%arg0: i32, %arg1: i32) -> (i32, i32, i32) {
    %c0_i32 = arith.constant 0 : i32
    %c0_i32_0 = arith.constant 0 : i32
    return %arg0, %arg1, %c0_i32 : i32, i32, i32
  }
}

</mosaic_0001>

<bundles_post_ra>
// kernel: tpu_custom_call.1
= control target key start
LH: loop header
LB: loop body
LE: loop exit
PB: predicated region body
PF: predicated region fallthrough
CT: control target
= control target key end

     0   :  { %10 = vsyncpa [#allocation3], 0  ;;  %s2030_s0 = inlined_call_operand.hbm [shape: f32[2,8,32], index: 0, kind: input, shape index: {}]   ;;  %s2031_s1 = inlined_call_operand.hbm [shape: f32[2,8,32], index: 1, kind: input, shape index: {}]   ;;  %s2032_s2 = inlined_call_operand.hbm [shape: f32[32,32], index: 2, kind: input, shape index: {}]   ;;  %s2033_s3 = inlined_call_operand.hbm [shape: f32[32,32], index: 3, kind: input, shape index: {}]   ;;  %s2034_s4 = inlined_call_operand.vmem [shape: f32[1,32], index: 4, kind: input, shape index: {}]   ;;  %s2035_s5 = inlined_call_operand.hbm [shape: f32[2,8,32], index: 5, kind: output, shape index: {}]  }
   0x1   :  { %11 = vsyncpa [#allocation6], 0 }
   0x2   :  { %12 = vsyncpa [#allocation9], 0 }
   0x3   :  { %13 = vsyncpa [#allocation4], 0  ;;  %s1578_s18 = smov [#allocation5]   ;;  %s1579_s20 = smov [#allocation2]  }
   0x4   :  { %s31_s19 = sshll.u32 %s1578_s18, 4  ;;  %s19_s21 = sshll.u32 %s1579_s20, 4  ;;  %s32_s19 = int_to_ptr.vmem [resolvable:$true] %s31_s19  ;;  %s20_s21 = int_to_ptr.vmem [resolvable:$true] %s19_s21 }
   0x5   :  { %s1478_s22 = scalar_lea.vmem %s32_s19, 256  ;;  %p1483_p1 = scmp.lt.s32.totalorder %s32_s19, %s32_s19 }
   0x6   :  { %p1479_p0 = scmp.ne.s32.totalorder %s32_s19, %s1478_s22  ;;  %p1484_p2 = scmp.lt.s32.totalorder %s1478_s22, %s1478_s22 }
   0x8   :  { %p1485_p3 = por %p1484_p2, %p1483_p1 }
   0xa   :  { %p1486_p4 = pnand %p1485_p3, %p1479_p0 }
   0xc   :  { %1489 = shalt.err (!%p1486_p4)
}
   0xd   :  { %s1580_s23 = smov 128   ;;  %s1581_s24 = smov 8  }
   0xe   :  { %37 = dma.hbm_to_vmem [thread:$0]  %s2031_s1, 256, %s32_s19, [#allocation6], %s1580_s23, %s1580_s23, %s1581_s24  }
   0xf   :  { %s1498_s27 = scalar_lea.vmem %s20_s21, 256  ;;  %p1503_p6 = scmp.lt.s32.totalorder %s20_s21, %s20_s21 }
  0x10   :  { %p1499_p5 = scmp.ne.s32.totalorder %s20_s21, %s1498_s27  ;;  %p1504_p7 = scmp.lt.s32.totalorder %s1498_s27, %s1498_s27 }
  0x12   :  { %p1505_p8 = por %p1504_p7, %p1503_p6 }
  0x14   :  { %p1506_p9 = pnand %p1505_p8, %p1499_p5 }
  0x16   :  { %1509 = shalt.err (!%p1506_p9)
}
  0x17   :  { %25 = dma.hbm_to_vmem [thread:$0]  %s2030_s0, 256, %s20_s21, [#allocation3], %s1580_s23, %s1580_s23, %s1581_s24  }
  0x18   :  { %s1582_s30 = smov [#allocation7]   ;;  %s1583_s7 = smov [#allocation8]  }
  0x19   :  { %s43_s6 = sshll.u32 %s1582_s30, 4  ;;  %s55_s8 = sshll.u32 %s1583_s7, 4  ;;  %s44_s6 = int_to_ptr.vmem [resolvable:$true] %s43_s6  ;;  %s56_s8 = int_to_ptr.vmem [resolvable:$true] %s55_s8 }
  0x1a   :  { %s1518_s1 = scalar_lea.vmem %s44_s6, 512  ;;  %p1523_p11 = scmp.lt.s32.totalorder %s44_s6, %s44_s6 }
  0x1b   :  { %p1519_p10 = scmp.ne.s32.totalorder %s44_s6, %s1518_s1  ;;  %p1524_p12 = scmp.lt.s32.totalorder %s1518_s1, %s1518_s1 }
  0x1d   :  { %p1525_p13 = por %p1524_p12, %p1523_p11 }
  0x1f   :  { %p1526_p0 = pnand %p1525_p13, %p1519_p10 }
  0x21   :  { %1529 = shalt.err (!%p1526_p0)
}
  0x22   :  { %49 = dma.hbm_to_vmem [thread:$0]  %s2032_s2, 512, %s44_s6, [#allocation6], %s1580_s23, %s1580_s23, %s1581_s24  }
  0x23   :  { %s1538_s0 = scalar_lea.vmem %s56_s8, 512  ;;  %p1543_p2 = scmp.lt.s32.totalorder %s56_s8, %s56_s8 }
  0x24   :  { %p1539_p1 = scmp.ne.s32.totalorder %s56_s8, %s1538_s0  ;;  %p1544_p3 = scmp.lt.s32.totalorder %s1538_s0, %s1538_s0 }
  0x26   :  { %p1545_p4 = por %p1544_p3, %p1543_p2 }
  0x28   :  { %p1546_p5 = pnand %p1545_p4, %p1539_p1 }
  0x2a   :  { %1549 = shalt.err (!%p1546_p5)
}
  0x2b   :  { %61 = dma.hbm_to_vmem [thread:$0]  %s2033_s3, 512, %s56_s8, [#allocation9], %s1580_s23, %s1580_s23, %s1581_s24  }
  0x2c   :  { %1570 = dma.done.wait [#allocation3], 256  }
  0x2d   :  { %1571 = vsyncadd [#allocation3], 4294967040 }
  0x2e   :  { %1572 = dma.done.wait [#allocation6], 768  }
  0x2f   :  { %1573 = vsyncadd [#allocation6], 4294966528 }
  0x30   :  { %1574 = dma.done.wait [#allocation9], 512  }
  0x31   :  { %1575 = vsyncadd [#allocation9], 4294966784  ;;  %v79_v0 = vld [vmem:[#allocation7 + $0x18] sm:$0xff]  ;;  %v78_v1 = vld [vmem:[#allocation7 + $0x10] sm:$0xff]  ;;  %vm89_vm0 = vcmask 261120   ;;  %v257_v14 = vlaneseq  ;;  %vm438_vm1 = vcmask 1041409  }
  0x32   :  { %1357 = vmatprep.subr.mxu0 %v79_v0  ;;  %v83_v2 = vld [vmem:[#allocation8 + $0x18] sm:$0xff]  ;;  %v82_v3 = vld [vmem:[#allocation8 + $0x10] sm:$0xff]  ;;  %v77_v4 = vld [vmem:[#allocation7 + $0x8] sm:$0xff]  ;;  %v1584_v12 = vmov 1966171168   ;;  %vm440_vm2 = vcmask 1042434  }
  0x33   :  { %1358 = vmatpush3.msra.mxu0 %v79_v0  ;;  %1368 = vmatprep.subr.mxu1 %v83_v2  ;;  %v85_v5 = vld [vmem:[#allocation2] sm:$0xff]  ;;  %v81_v7 = vld [vmem:[#allocation8 + $0x8] sm:$0xff]  ;;  %v1644_v10 = vld [vmem:[#allocation5] sm:$0xff]  ;;  %v255_v13 = vunpack.c.l.s4 %v1584_v12  ;;  %v1654_v16 = vshrl.u32 %v257_v14, 7  ;;  %vm442_vm3 = vcmask 1043459   ;;  %vm444_vm4 = vcmask 1044484  }
  0x34   :  { %1359 = vmatprep.subr.mxu0 %v78_v1  ;;  %1369 = vmatpush3.msra.mxu1 %v83_v2  ;;  %v76_v6 = vld [vmem:[#allocation7] sm:$0xff]  ;;  %v86_v8 = vld [vmem:[#allocation2 + $0x8] sm:$0xff]  ;;  %v1646_v11 = vld [vmem:[#allocation5 + $0x8] sm:$0xff]  ;;  %vm446_vm5 = vcmask 1045509   ;;  %vm448_vm6 = vcmask 1046534   ;;  %vm450_vm7 = vcmask 1047559  }
  0x35   :  { %1360 = vmatpush3.msra.mxu0 %v78_v1  ;;  %1370 = vmatprep.subr.mxu1 %v82_v3  ;;  %v80_v9 = vld [vmem:[#allocation8] sm:$0xff]  ;;  %v256_v15 = vunpack.c.0.s8 %v255_v13  ;;  %v1658_v22 = vsub.s32 0, %v1654_v16  ;;  %vm453_vm8 = vcmask 64512   ;;  %vm1587_vm9 = vmmov 0  }
  0x36   :  { %1361 = vmatprep.subr.mxu0 %v77_v4  ;;  %1365 = vmatprep.mubr.msk.f32.mxu0 %vm89_vm0, %v85_v5 }
  0x37   :  { %1362 = vmatpush3.msra.mxu0 %v77_v4  ;;  %1371 = vmatpush3.msra.mxu1 %v82_v3  ;;  %v259_v17 = vsub.s32 %v256_v15, %v1654_v16 }
  0x38   :  { %1363 = vmatprep.subr.mxu0 %v76_v6  ;;  %1372 = vmatprep.subr.mxu1 %v81_v7 }
  0x39   :  { %1364 = vmatpush3.msra.mxu0 %v76_v6  ;;  %1373 = vmatpush3.msra.mxu1 %v81_v7  ;;  %v1689_v6 = vld [vmem:[%s2034_s4] ss:$0 sm:$0xff]  ;;  %s1588_s4 = smov [#allocation10]  }
  0x3a   :  { %1366 = vmatmul.mubr.msk.f32.vlgmr.msra.gmra.mxu0 %vm89_vm0, %v86_v8  ;;  %1374 = vmatprep.subr.mxu1 %v80_v9  ;;  %s1320_s13 = sshll.u32 %s1588_s4, 4  ;;  %s1321_s13 = int_to_ptr.vmem [resolvable:$true] %s1320_s13 }
  0x3b   :  { %1375 = vmatpush3.msra.mxu1 %v80_v9  ;;  %1376 = vmatprep.mubr.msk.f32.mxu1 %vm89_vm0, %v1644_v10  ;;  %s1550_s14 = scalar_lea.vmem %s1321_s13, 256  ;;  %p1555_p7 = scmp.lt.s32.totalorder %s1321_s13, %s1321_s13 }
  0x3c   :  { %1377 = vmatmul.mubr.msk.f32.vlgmr.msra.gmra.mxu1 %vm89_vm0, %v1646_v11  ;;  %p1551_p6 = scmp.ne.s32.totalorder %s1321_s13, %s1550_s14  ;;  %p1556_p8 = scmp.lt.s32.totalorder %s1550_s14, %s1550_s14 }
  0x3e   :  { %p1557_p9 = por %p1556_p8, %p1555_p7 }
  0x40   :  { %p1558_p10 = pnand %p1557_p9, %p1551_p6 }
  0xfa   :  { %v1367_v18 = vpop.f32.mrf.mxu0 }
  0xfb   :  { %v792_v19 = vcombine.high %v1367_v18, %v1367_v18  ;;  %v799_v20 = vrot.slane %v1367_v18, %v259_v17 }
  0xfc   :  { %v162_v21 = vpop.f32.mrf.mxu0  ;;  %v1661_v34 = vpop.f32.mrf.mxu1 }
  0xfd   :  { %v807_v23 = vcombine.high %v799_v20, %v799_v20  ;;  %v815_v24 = vrot.slane %v799_v20, %v259_v17  ;;  %v253_v25 = vcombine.high %v162_v21, %v162_v21  ;;  %v260_v26 = vrot.slane %v162_v21, %v259_v17 }
  0xfe   :  { %v806_v27 = vrot.slane %v792_v19, %v259_v17  ;;  %v1669_v46 = vpop.f32.mrf.mxu1 }
  0xff   :  { %v829_v28 = vrot.slane %v807_v23, %v259_v17  ;;  %v267_v29 = vrot.slane %v253_v25, %v259_v17  ;;  %v268_v30 = vcombine.high %v260_v26, %v260_v26  ;;  %v276_v31 = vrot.slane %v260_v26, %v259_v17 }
 0x100   :  { %v837_v32 = vcombine.high %v815_v24, %v815_v24  ;;  %v844_v33 = vrot.slane %v815_v24, %v1658_v22  ;;  %v822_v35 = vrot.slane %v806_v27, %v259_v17  ;;  %v808_v43 = vcombine.high %v806_v27, %v806_v27 }
 0x101   :  { %v848_v36 = vrot.slane %v829_v28, %v1658_v22  ;;  %v283_v37 = vrot.slane %v267_v29, %v259_v17  ;;  %v290_v38 = vrot.slane %v268_v30, %v259_v17  ;;  %v298_v39 = vcombine.high %v276_v31, %v276_v31 }
 0x102   :  { %v852_v40 = vrot.slane %v837_v32, %v1658_v22  ;;  %v305_v41 = vrot.slane %v276_v31, %v1658_v22  ;;  %v881_v42 = vadd.f32 %v1661_v34, %v844_v33  ;;  %v839_v47 = vcombine.high %v829_v28, %v829_v28 }
 0x103   :  { %v309_v44 = vrot.slane %v290_v38, %v1658_v22  ;;  %v313_v45 = vrot.slane %v298_v39, %v1658_v22  ;;  %v860_v48 = vrot.slane %v822_v35, %v1658_v22  ;;  %v269_v50 = vcombine.high %v267_v29, %v267_v29 }
 0x104   :  { %1402 = vtanh.f32 %v881_v42  ;;  %v342_v49 = vadd.f32 %v305_v41, %v1669_v46  ;;  %v321_v51 = vrot.slane %v283_v37, %v1658_v22  ;;  %v882_v52 = vadd.f32 %v1661_v34, %v848_v36 }
 0x105   :  { %v343_v53 = vadd.f32 %v309_v44, %v1669_v46  ;;  %v300_v54 = vcombine.high %v290_v38, %v290_v38  ;;  %v883_v55 = vadd.f32 %v1661_v34, %v852_v40  ;;  %v344_v56 = vadd.f32 %v313_v45, %v1669_v46 }
 0x106   :  { %1404 = vtanh.f32 %v342_v49  ;;  %v836_v57 = vrot.slane %v808_v43, %v259_v17  ;;  %v856_v58 = vrot.slane %v839_v47, %v1658_v22  ;;  %v885_v59 = vadd.f32 %v1661_v34, %v860_v48 }
 0x107   :  { %1406 = vtanh.f32 %v882_v52  ;;  %v297_v60 = vrot.slane %v269_v50, %v259_v17  ;;  %v317_v61 = vrot.slane %v300_v54, %v1658_v22  ;;  %v346_v62 = vadd.f32 %v321_v51, %v1669_v46 }
 0x108   :  { %1408 = vtanh.f32 %v343_v53  ;;  %v838_v63 = vcombine.high %v822_v35, %v822_v35  ;;  %v864_v0 = vrot.slane %v836_v57, %v1658_v22  ;;  %v884_v1 = vadd.f32 %v1661_v34, %v856_v58 }
 0x109   :  { %1410 = vtanh.f32 %v883_v55  ;;  %v299_v2 = vcombine.high %v283_v37, %v283_v37  ;;  %v325_v3 = vrot.slane %v297_v60, %v1658_v22  ;;  %v345_v4 = vadd.f32 %v317_v61, %v1669_v46 }
 0x10a   :  { %1412 = vtanh.f32 %v344_v56  ;;  %v840_v5 = vcombine.high %v836_v57, %v836_v57  ;;  %v868_v7 = vrot.slane %v838_v63, %v1658_v22  ;;  %v886_v8 = vadd.f32 %v1661_v34, %v864_v0 }
 0x10b   :  { %1414 = vtanh.f32 %v885_v59  ;;  %v301_v12 = vcombine.high %v297_v60, %v297_v60  ;;  %v329_v13 = vrot.slane %v299_v2, %v1658_v22  ;;  %v347_v17 = vadd.f32 %v325_v3, %v1669_v46 }
 0x10c   :  { %1416 = vtanh.f32 %v346_v62  ;;  %v872_v19 = vrot.slane %v840_v5, %v1658_v22  ;;  %v887_v24 = vadd.f32 %v1661_v34, %v868_v7 }
 0x10d   :  { %1418 = vtanh.f32 %v884_v1  ;;  %v333_v26 = vrot.slane %v301_v12, %v1658_v22  ;;  %v348_v31 = vadd.f32 %v329_v13, %v1669_v46 }
 0x10e   :  { %1420 = vtanh.f32 %v345_v4  ;;  %v888_v36 = vadd.f32 %v1661_v34, %v872_v19 }
 0x10f   :  { %1422 = vtanh.f32 %v886_v8  ;;  %v349_v40 = vadd.f32 %v333_v26, %v1669_v46 }
 0x110   :  { %1424 = vtanh.f32 %v347_v17 }
 0x111   :  { %v1403_v9 = vpop.eup %1402  ;;  %1426 = vtanh.f32 %v887_v24 }
 0x112   :  { %v897_v15 = vmul.f32 %v1403_v9, %v1689_v6  ;;  %1428 = vtanh.f32 %v348_v31 }
 0x113   :  { %v1405_v18 = vpop.eup %1404  ;;  %1430 = vtanh.f32 %v888_v36 }
 0x114   :  { %v1407_v20 = vpop.eup %1406  ;;  %v905_v21 = vsel %vm89_vm0, %v897_v15, 0.0  ;;  %v364_v23 = vmul.f32 %v1405_v18, %v1689_v6  ;;  %1432 = vtanh.f32 %v349_v40  ;;  %v405_v18 = vand.u32 127, %v257_v14 }
 0x115   :  { %v1409_v25 = vpop.eup %1408  ;;  %906 = vadd.xlane.f32.xlu1 %v905_v21  ;;  %v898_v27 = vmul.f32 %v1407_v20, %v1689_v6 }
 0x116   :  { %v1411_v28 = vpop.eup %1410  ;;  %v372_v29 = vsel %vm89_vm0, %v364_v23, 0.0  ;;  %v365_v30 = vmul.f32 %v1409_v25, %v1689_v6  ;;  %v1753_v21 = vsub.s32 %v405_v18, %v1654_v16 }
 0x117   :  { %v1413_v32 = vpop.eup %1412  ;;  %373 = vadd.xlane.f32.xlu0 %v372_v29  ;;  %v908_v33 = vsel %vm89_vm0, %v898_v27, 0.0  ;;  %v899_v35 = vmul.f32 %v1411_v28, %v1689_v6 }
 0x118   :  { %v1415_v37 = vpop.eup %1414  ;;  %v375_v38 = vsel %vm89_vm0, %v365_v30, 0.0  ;;  %v366_v39 = vmul.f32 %v1413_v32, %v1689_v6 }
 0x119   :  { %909 = vadd.xlane.f32.xlu1 %v908_v33  ;;  %v1417_v41 = vpop.eup %1416  ;;  %v911_v42 = vsel %vm89_vm0, %v899_v35, 0.0  ;;  %v901_v43 = vmul.f32 %v1415_v37, %v1689_v6 }
 0x11a   :  { %v1419_v44 = vpop.eup %1418  ;;  %v378_v34 = vsel %vm89_vm0, %v366_v39, 0.0  ;;  %v368_v45 = vmul.f32 %v1417_v41, %v1689_v6 }
 0x11b   :  { %376 = vadd.xlane.f32.xlu0 %v375_v38  ;;  %v1421_v47 = vpop.eup %1420  ;;  %v917_v48 = vsel %vm89_vm0, %v901_v43, 0.0  ;;  %v900_v46 = vmul.f32 %v1419_v44, %v1689_v6 }
 0x11c   :  { %v1423_v49 = vpop.eup %1422  ;;  %v384_v50 = vsel %vm89_vm0, %v368_v45, 0.0  ;;  %v367_v51 = vmul.f32 %v1421_v47, %v1689_v6 }
 0x11d   :  { %912 = vadd.xlane.f32.xlu1 %v911_v42  ;;  %v1425_v52 = vpop.eup %1424  ;;  %v914_v53 = vsel %vm89_vm0, %v900_v46, 0.0  ;;  %v902_v54 = vmul.f32 %v1423_v49, %v1689_v6 }
 0x11e   :  { %v1427_v55 = vpop.eup %1426  ;;  %v381_v56 = vsel %vm89_vm0, %v367_v51, 0.0  ;;  %v369_v57 = vmul.f32 %v1425_v52, %v1689_v6 }
 0x11f   :  { %379 = vadd.xlane.f32.xlu0 %v378_v34  ;;  %v1429_v58 = vpop.eup %1428  ;;  %v920_v59 = vsel %vm89_vm0, %v902_v54, 0.0  ;;  %v903_v60 = vmul.f32 %v1427_v55, %v1689_v6 }
 0x120   :  { %v1431_v61 = vpop.eup %1430  ;;  %v387_v62 = vsel %vm89_vm0, %v369_v57, 0.0  ;;  %v370_v63 = vmul.f32 %v1429_v58, %v1689_v6 }
 0x121   :  { %918 = vadd.xlane.f32.xlu1 %v917_v48  ;;  %v1433_v0 = vpop.eup %1432  ;;  %v923_v1 = vsel %vm89_vm0, %v903_v60, 0.0  ;;  %v904_v2 = vmul.f32 %v1431_v61, %v1689_v6  ;;  %v1585_v61 = vmov 0  }
 0x122   :  { %v390_v3 = vsel %vm89_vm0, %v370_v63, 0.0  ;;  %v371_v4 = vmul.f32 %v1433_v0, %v1689_v6  ;;  %1401 = vset.pattern.permute.xlu0 %v1585_v61  ;;  %1400 = vset.pattern.permute.xlu1 %v1585_v61  ;;  %v1818_v63 = vsub.s32 2, %v1654_v16  ;;  %v1821_v0 = vsub.s32 4, %v1654_v16 }
 0x123   :  { %385 = vadd.xlane.f32.xlu0 %v384_v50  ;;  %v926_v5 = vsel %vm89_vm0, %v904_v2, 0.0 }
 0x124   :  { %v393_v7 = vsel %vm89_vm0, %v371_v4, 0.0 }
 0x125   :  { %915 = vadd.xlane.f32.xlu1 %v914_v53 }
 0x127   :  { %382 = vadd.xlane.f32.xlu0 %v381_v56 }
 0x129   :  { %921 = vadd.xlane.f32.xlu1 %v920_v59 }
 0x12b   :  { %388 = vadd.xlane.f32.xlu0 %v387_v62  ;;  %v1815_v62 = vsub.s32 1, %v1654_v16 }
 0x12d   :  { %924 = vadd.xlane.f32.xlu1 %v923_v1  ;;  %v1824_v1 = vsub.s32 5, %v1654_v16 }
 0x12f   :  { %391 = vadd.xlane.f32.xlu0 %v390_v3 }
 0x131   :  { %927 = vadd.xlane.f32.xlu1 %v926_v5  ;;  %v1829_v5 = vsub.s32 3, %v1654_v16 }
 0x133   :  { %394 = vadd.xlane.f32.xlu0 %v393_v7 }
 0x19e   :  { %v1733_v8 = vpop.xlane.xlu1 %906 }
 0x19f   :  { %v940_v14 = vrot.slane %v1733_v8, %v1753_v21 }
 0x1a0   :  { %v1735_v9 = vpop.xlane.xlu0 %373 }
 0x1a1   :  { %v409_v31 = vrot.slane %v1735_v9, %v1753_v21 }
 0x1a2   :  { %v1737_v12 = vpop.xlane.xlu1 %909 }
 0x1a3   :  { %v944_v24 = vrot.slane %v1737_v12, %v1753_v21 }
 0x1a4   :  { %v1739_v13 = vpop.xlane.xlu0 %376 }
 0x1a5   :  { %v413_v27 = vrot.slane %v1739_v13, %v1753_v21  ;;  %v969_v32 = vsel %vm438_vm1, %v944_v24, %v940_v14 }
 0x1a6   :  { %v1741_v15 = vpop.xlane.xlu1 %912 }
 0x1a7   :  { %v948_v25 = vrot.slane %v1741_v15, %v1753_v21  ;;  %v439_v37 = vsel %vm438_vm1, %v413_v27, %v409_v31  ;;  %v1840_v31 = vsub.s32 6, %v1654_v16 }
 0x1a8   :  { %v1743_v17 = vpop.xlane.xlu0 %379 }
 0x1a9   :  { %v417_v29 = vrot.slane %v1743_v17, %v1753_v21  ;;  %v970_v35 = vsel %vm440_vm2, %v948_v25, %v969_v32 }
 0x1aa   :  { %v1745_v6 = vpop.xlane.xlu1 %918 }
 0x1ab   :  { %v441_v40 = vsel %vm440_vm2, %v417_v29, %v439_v37  ;;  %v956_v41 = vrot.slane %v1745_v6, %v1753_v21 }
 0x1ac   :  { %v1748_v19 = vpop.xlane.xlu0 %385 }
 0x1ad   :  { %v425_v45 = vrot.slane %v1748_v19, %v1753_v21 }
 0x1ae   :  { %v1750_v20 = vpop.xlane.xlu1 %915 }
 0x1af   :  { %v952_v28 = vrot.slane %v1750_v20, %v1753_v21 }
 0x1b0   :  { %v1755_v23 = vpop.xlane.xlu0 %382 }
 0x1b1   :  { %v421_v33 = vrot.slane %v1755_v23, %v1753_v21  ;;  %v971_v38 = vsel %vm442_vm3, %v952_v28, %v970_v35 }
 0x1b2   :  { %v1761_v26 = vpop.xlane.xlu1 %921  ;;  %v972_v46 = vsel %vm444_vm4, %v956_v41, %v971_v38 }
 0x1b3   :  { %v960_v39 = vrot.slane %v1761_v26, %v1753_v21  ;;  %v443_v44 = vsel %vm442_vm3, %v421_v33, %v441_v40 }
 0x1b4   :  { %v1771_v30 = vpop.xlane.xlu0 %388  ;;  %v445_v53 = vsel %vm444_vm4, %v425_v45, %v443_v44 }
 0x1b5   :  { %v429_v34 = vrot.slane %v1771_v30, %v1753_v21  ;;  %v973_v50 = vsel %vm446_vm5, %v960_v39, %v972_v46 }
 0x1b6   :  { %v1779_v36 = vpop.xlane.xlu1 %924 }
 0x1b7   :  { %v964_v42 = vrot.slane %v1779_v36, %v1753_v21  ;;  %v447_v56 = vsel %vm446_vm5, %v429_v34, %v445_v53 }
 0x1b8   :  { %v1790_v43 = vpop.xlane.xlu0 %391 }
 0x1b9   :  { %v433_v47 = vrot.slane %v1790_v43, %v1753_v21  ;;  %v974_v52 = vsel %vm448_vm6, %v964_v42, %v973_v50 }
 0x1ba   :  { %v928_v48 = vpop.xlane.xlu1 %927 }
 0x1bb   :  { %v968_v49 = vrot.slane %v928_v48, %v1753_v21  ;;  %v449_v58 = vsel %vm448_vm6, %v433_v47, %v447_v56 }
 0x1bc   :  { %v1802_v51 = vpop.xlane.xlu0 %394 }
 0x1bd   :  { %v437_v54 = vrot.slane %v1802_v51, %v1753_v21  ;;  %v975_v55 = vsel %vm450_vm7, %v968_v49, %v974_v52 }
 0x1be   :  { %v977_v57 = vsel %vm453_vm8, %v975_v55, -inf }
 0x1bf   :  { %978 = vmax.xlane.f32.xlu1 %v977_v57  ;;  %v451_v59 = vsel %vm450_vm7, %v437_v54, %v449_v58 }
 0x1c0   :  { %v454_v60 = vsel %vm453_vm8, %v451_v59, -inf }
 0x1c1   :  { %455 = vmax.xlane.f32.xlu0 %v454_v60 }
 0x248   :  { %v979_v2 = vpop.xlane.xlu1 %978 }
 0x249   :  { %v984_v3 = vrot.slane %v979_v2, %v1658_v22  ;;  %v988_v4 = vrot.slane %v979_v2, %v1815_v62  ;;  %v992_v7 = vrot.slane %v979_v2, %v1818_v63  ;;  %v1000_v18 = vrot.slane %v979_v2, %v1821_v0 }
 0x24a   :  { %v1004_v24 = vrot.slane %v979_v2, %v1824_v1  ;;  %v1837_v28 = vpop.xlane.xlu0 %455  ;;  %v996_v32 = vrot.slane %v979_v2, %v1829_v5 }
 0x24b   :  { %v1021_v25 = vsub.f32 %v1733_v8, %v984_v3  ;;  %v1022_v14 = vsub.f32 %v1737_v12, %v988_v4  ;;  %v1025_v27 = vsub.f32 %v1745_v6, %v1000_v18  ;;  %v1023_v33 = vsub.f32 %v1741_v15, %v992_v7 }
 0x24c   :  { %v1026_v37 = vsub.f32 %v1761_v26, %v1004_v24  ;;  %v461_v8 = vrot.slane %v1837_v28, %v1658_v22  ;;  %v1848_v12 = vsub.s32 7, %v1654_v16  ;;  %v1008_v6 = vrot.slane %v979_v2, %v1840_v31 }
 0x24d   :  { %v1029_v29 = vmul.f32 1.442695, %v1021_v25  ;;  %v1031_v35 = vmul.f32 1.442695, %v1022_v14  ;;  %v1037_v38 = vmul.f32 1.442695, %v1025_v27  ;;  %v1024_v39 = vsub.f32 %v1750_v20, %v996_v32 }
 0x24e   :  { %v1033_v40 = vmul.f32 1.442695, %v1023_v33  ;;  %v1039_v41 = vmul.f32 1.442695, %v1026_v37  ;;  %v465_v15 = vrot.slane %v1837_v28, %v1815_v62  ;;  %v498_v26 = vsub.f32 %v1735_v9, %v461_v8 }
 0x24f   :  { %1434 = vpow2.f32 %v1029_v29  ;;  %v1012_v42 = vrot.slane %v979_v2, %v1848_v12  ;;  %v1027_v44 = vsub.f32 %v1779_v36, %v1008_v6  ;;  %v1035_v16 = vmul.f32 1.442695, %v1024_v39 }
 0x250   :  { %1436 = vpow2.f32 %v1031_v35  ;;  %v469_v34 = vrot.slane %v1837_v28, %v1818_v63  ;;  %v499_v20 = vsub.f32 %v1739_v13, %v465_v15  ;;  %v506_v45 = vmul.f32 1.442695, %v498_v26 }
 0x251   :  { %1438 = vpow2.f32 %v1037_v38  ;;  %v1028_v47 = vsub.f32 %v928_v48, %v1012_v42  ;;  %v1041_v46 = vmul.f32 1.442695, %v1027_v44  ;;  %v473_v49 = vrot.slane %v1837_v28, %v1829_v5 }
 0x252   :  { %1440 = vpow2.f32 %v1033_v40  ;;  %v500_v9 = vsub.f32 %v1743_v17, %v469_v34  ;;  %v508_v50 = vmul.f32 1.442695, %v499_v20  ;;  %v477_v13 = vrot.slane %v1837_v28, %v1821_v0 }
 0x253   :  { %1442 = vpow2.f32 %v1039_v41  ;;  %v1043_v52 = vmul.f32 1.442695, %v1028_v47  ;;  %v501_v48 = vsub.f32 %v1755_v23, %v473_v49  ;;  %v481_v56 = vrot.slane %v1837_v28, %v1824_v1 }
 0x254   :  { %1444 = vpow2.f32 %v1035_v16  ;;  %v510_v54 = vmul.f32 1.442695, %v500_v9  ;;  %v502_v57 = vsub.f32 %v1748_v19, %v477_v13  ;;  %v485_v60 = vrot.slane %v1837_v28, %v1840_v31 }
 0x255   :  { %1446 = vpow2.f32 %v506_v45  ;;  %v512_v58 = vmul.f32 1.442695, %v501_v48  ;;  %v503_v61 = vsub.f32 %v1771_v30, %v481_v56  ;;  %v489_v4 = vrot.slane %v1837_v28, %v1848_v12 }
 0x256   :  { %1448 = vpow2.f32 %v1041_v46  ;;  %v514_v2 = vmul.f32 1.442695, %v502_v57  ;;  %v504_v7 = vsub.f32 %v1790_v43, %v485_v60 }
 0x257   :  { %1450 = vpow2.f32 %v508_v50  ;;  %v516_v18 = vmul.f32 1.442695, %v503_v61  ;;  %v505_v25 = vsub.f32 %v1802_v51, %v489_v4 }
 0x258   :  { %1452 = vpow2.f32 %v1043_v52  ;;  %v518_v14 = vmul.f32 1.442695, %v504_v7 }
 0x259   :  { %1454 = vpow2.f32 %v510_v54  ;;  %v520_v43 = vmul.f32 1.442695, %v505_v25 }
 0x25a   :  { %1456 = vpow2.f32 %v512_v58 }
 0x25b   :  { %1458 = vpow2.f32 %v514_v2 }
 0x25c   :  { %v1863_v36 = vpop.eup %1434  ;;  %1460 = vpow2.f32 %v516_v18 }
 0x25d   :  { %1054 = vperm.xlu1 %1400, %v1863_v36   ;;  %v1866_v53 = vpop.eup %1436  ;;  %1462 = vpow2.f32 %v518_v14 }
 0x25e   :  { %v1871_v55 = vpop.eup %1438  ;;  %1464 = vpow2.f32 %v520_v43 }
 0x25f   :  { %1066 = vperm.xlu0 %1401, %v1871_v55   ;;  %v1875_v17 = vpop.eup %1440 }
 0x260   :  { %v1880_v59 = vpop.eup %1442 }
 0x261   :  { %1057 = vperm.xlu1 %1400, %v1866_v53   ;;  %v1884_v23 = vpop.eup %1444 }
 0x262   :  { %v1889_v3 = vpop.eup %1446 }
 0x263   :  { %1069 = vperm.xlu0 %1401, %v1880_v59   ;;  %v1893_v19 = vpop.eup %1448 }
 0x264   :  { %v1898_v24 = vpop.eup %1450 }
 0x265   :  { %1060 = vperm.xlu1 %1400, %v1875_v17   ;;  %v1902_v30 = vpop.eup %1452 }
 0x266   :  { %v1905_v27 = vpop.eup %1454 }
 0x267   :  { %531 = vperm.xlu0 %1401, %v1889_v3   ;;  %v1909_v28 = vpop.eup %1456 }
 0x268   :  { %v1912_v29 = vpop.eup %1458 }
 0x269   :  { %1063 = vperm.xlu1 %1400, %v1884_v23   ;;  %v1915_v51 = vpop.eup %1460 }
 0x26a   :  { %v1918_v32 = vpop.eup %1462 }
 0x26b   :  { %1072 = vperm.xlu0 %1401, %v1893_v19   ;;  %v1921_v33 = vpop.eup %1464 }
 0x26d   :  { %534 = vperm.xlu1 %1400, %v1898_v24  }
 0x26f   :  { %1075 = vperm.xlu0 %1401, %v1902_v30  }
 0x271   :  { %537 = vperm.xlu1 %1400, %v1905_v27  }
 0x275   :  { %540 = vperm.xlu1 %1400, %v1909_v28  }
 0x279   :  { %543 = vperm.xlu1 %1400, %v1912_v29  }
 0x27d   :  { %546 = vperm.xlu1 %1400, %v1915_v51  }
 0x281   :  { %549 = vperm.xlu1 %1400, %v1918_v32  }
 0x285   :  { %552 = vperm.xlu1 %1400, %v1921_v33  }
 0x2d8   :  { %v1055_v35 = vpop.permute.xlu1 %1054 }
 0x2d9   :  { %v1080_v41 = vrot.slane %v1055_v35, %v1753_v21 }
 0x2da   :  { %v1067_v37 = vpop.permute.xlu0 %1066 }
 0x2db   :  { %v1096_v16 = vrot.slane %v1067_v37, %v1753_v21 }
 0x2dc   :  { %v1058_v38 = vpop.permute.xlu1 %1057 }
 0x2dd   :  { %v1084_v39 = vrot.slane %v1058_v38, %v1753_v21 }
 0x2de   :  { %v1070_v8 = vpop.permute.xlu0 %1069 }
 0x2df   :  { %v1109_v42 = vsel %vm438_vm1, %v1084_v39, %v1080_v41  ;;  %v1100_v20 = vrot.slane %v1070_v8, %v1753_v21 }
 0x2e0   :  { %v1061_v6 = vpop.permute.xlu1 %1060 }
 0x2e1   :  { %v1088_v40 = vrot.slane %v1061_v6, %v1753_v21 }
 0x2e2   :  { %v532_v15 = vpop.permute.xlu0 %531 }
 0x2e3   :  { %v1110_v34 = vsel %vm440_vm2, %v1088_v40, %v1109_v42  ;;  %v557_v7 = vrot.slane %v532_v15, %v1753_v21 }
 0x2e4   :  { %v1064_v26 = vpop.permute.xlu1 %1063 }
 0x2e5   :  { %v1092_v44 = vrot.slane %v1064_v26, %v1753_v21 }
 0x2e6   :  { %v1073_v46 = vpop.permute.xlu0 %1072 }
 0x2e7   :  { %v1111_v45 = vsel %vm442_vm3, %v1092_v44, %v1110_v34  ;;  %v1104_v50 = vrot.slane %v1073_v46, %v1753_v21 }
 0x2e8   :  { %v1112_v47 = vsel %vm444_vm4, %v1096_v16, %v1111_v45  ;;  %v535_v49 = vpop.permute.xlu1 %534 }
 0x2e9   :  { %v1113_v9 = vsel %vm446_vm5, %v1100_v20, %v1112_v47  ;;  %v561_v2 = vrot.slane %v535_v49, %v1753_v21 }
 0x2ea   :  { %v1076_v52 = vpop.permute.xlu0 %1075  ;;  %v1114_v48 = vsel %vm448_vm6, %v1104_v50, %v1113_v9 }
 0x2eb   :  { %v1108_v54 = vrot.slane %v1076_v52, %v1753_v21  ;;  %v586_v43 = vsel %vm438_vm1, %v561_v2, %v557_v7  ;;  %v1586_v2 = vmov 0.0  }
 0x2ec   :  { %v538_v13 = vpop.permute.xlu1 %537  ;;  %1384 = vmatprep.subr.mxu1 %v1586_v2  ;;  %1386 = vmatprep.mubr.msk.f32.mxu1 %vm1587_vm9, %v1586_v2 }
 0x2ed   :  { %v1115_v56 = vsel %vm450_vm7, %v1108_v54, %v1114_v48  ;;  %v565_v4 = vrot.slane %v538_v13, %v1753_v21  ;;  %1385 = vmatpush3.msra.mxu1 %v1646_v11  ;;  %1379 = vmatprep.subr.mxu0 %v1586_v2 }
 0x2ee   :  { %v1117_v57 = vsel %vm453_vm8, %v1115_v56, 0.0  ;;  %1380 = vmatpush3.msra.mxu0 %v1644_v10  ;;  %1381 = vmatprep.mubr.msk.f32.mxu0 %vm1587_vm9, %v1586_v2 }
 0x2ef   :  { %1118 = vadd.xlane.f32.xlu0 %v1117_v57  ;;  %v587_v37 = vsel %vm440_vm2, %v565_v4, %v586_v43 }
 0x2f0   :  { %v541_v58 = vpop.permute.xlu1 %540 }
 0x2f1   :  { %v569_v18 = vrot.slane %v541_v58, %v1753_v21 }
 0x2f3   :  { %v588_v8 = vsel %vm442_vm3, %v569_v18, %v587_v37 }
 0x2f4   :  { %v544_v60 = vpop.permute.xlu1 %543 }
 0x2f5   :  { %v573_v25 = vrot.slane %v544_v60, %v1753_v21 }
 0x2f7   :  { %v589_v6 = vsel %vm444_vm4, %v573_v25, %v588_v8 }
 0x2f8   :  { %v547_v61 = vpop.permute.xlu1 %546 }
 0x2f9   :  { %v577_v35 = vrot.slane %v547_v61, %v1753_v21 }
 0x2fb   :  { %v590_v40 = vsel %vm446_vm5, %v577_v35, %v589_v6 }
 0x2fc   :  { %v550_v14 = vpop.permute.xlu1 %549 }
 0x2fd   :  { %v581_v38 = vrot.slane %v550_v14, %v1753_v21 }
 0x2ff   :  { %v591_v15 = vsel %vm448_vm6, %v581_v38, %v590_v40 }
 0x300   :  { %v553_v39 = vpop.permute.xlu1 %552 }
 0x301   :  { %v585_v41 = vrot.slane %v553_v39, %v1753_v21 }
 0x303   :  { %v592_v26 = vsel %vm450_vm7, %v585_v41, %v591_v15 }
 0x304   :  { %v594_v42 = vsel %vm453_vm8, %v592_v26, 0.0 }
 0x305   :  { %595 = vadd.xlane.f32.xlu1 %v594_v42 }
 0x378   :  { %v1119_v44 = vpop.xlane.xlu0 %1118 }
 0x379   :  { %1466 = vrcp.f32 %v1119_v44 }
 0x386   :  { %v1467_v16 = vpop.eup %1466 }
 0x387   :  { %v1129_v34 = vrot.slane %v1467_v16, %v1815_v62  ;;  %v1125_v20 = vrot.slane %v1467_v16, %v1658_v22  ;;  %v1133_v46 = vrot.slane %v1467_v16, %v1818_v63  ;;  %v1137_v50 = vrot.slane %v1467_v16, %v1829_v5 }
 0x388   :  { %v1141_v13 = vrot.slane %v1467_v16, %v1821_v0  ;;  %v1149_v58 = vrot.slane %v1467_v16, %v1840_v31 }
 0x389   :  { %v1163_v45 = vmul.f32 %v1866_v53, %v1129_v34  ;;  %v1162_v47 = vmul.f32 %v1863_v36, %v1125_v20  ;;  %v1164_v9 = vmul.f32 %v1875_v17, %v1133_v46  ;;  %v1165_v52 = vmul.f32 %v1884_v23, %v1137_v50 }
 0x38a   :  { %v1166_v53 = vmul.f32 %v1871_v55, %v1141_v13  ;;  %v1145_v36 = vrot.slane %v1467_v16, %v1824_v1  ;;  %v1153_v55 = vrot.slane %v1467_v16, %v1848_v12 }
 0x38b   :  { %1182 = vperm.xlu0 %1401, %v1163_v45   ;;  %1179 = vperm.xlu1 %1400, %v1162_v47  }
 0x38c   :  { %v1167_v48 = vmul.f32 %v1880_v59, %v1145_v36  ;;  %v1168_v59 = vmul.f32 %v1893_v19, %v1149_v58 }
 0x38e   :  { %v596_v49 = vpop.xlane.xlu1 %595 }
 0x38f   :  { %1468 = vrcp.f32 %v596_v49  ;;  %1185 = vperm.xlu0 %1401, %v1164_v9  }
 0x393   :  { %1188 = vperm.xlu0 %1401, %v1165_v52  }
 0x397   :  { %1191 = vperm.xlu0 %1401, %v1166_v53  }
 0x39b   :  { %1194 = vperm.xlu0 %1401, %v1167_v48  }
 0x39c   :  { %v1469_v54 = vpop.eup %1468 }
 0x39d   :  { %v602_v17 = vrot.slane %v1469_v54, %v1658_v22  ;;  %v606_v56 = vrot.slane %v1469_v54, %v1815_v62  ;;  %v610_v60 = vrot.slane %v1469_v54, %v1818_v63  ;;  %v614_v22 = vrot.slane %v1469_v54, %v1829_v5 }
 0x39e   :  { %v1169_v62 = vmul.f32 %v1902_v30, %v1153_v55  ;;  %v622_v5 = vrot.slane %v1469_v54, %v1824_v1 }
 0x39f   :  { %v639_v57 = vmul.f32 %v1889_v3, %v602_v17  ;;  %v640_v23 = vmul.f32 %v1898_v24, %v606_v56  ;;  %v641_v61 = vmul.f32 %v1905_v27, %v610_v60  ;;  %v642_v3 = vmul.f32 %v1909_v28, %v614_v22 }
 0x3a0   :  { %v618_v24 = vrot.slane %v1469_v54, %v1821_v0  ;;  %v644_v19 = vmul.f32 %v1915_v51, %v622_v5  ;;  %v626_v0 = vrot.slane %v1469_v54, %v1840_v31  ;;  %v630_v27 = vrot.slane %v1469_v54, %v1848_v12 }
 0x3a1   :  { %656 = vperm.xlu0 %1401, %v639_v57   ;;  %659 = vperm.xlu1 %1400, %v640_v23  }
 0x3a2   :  { %v643_v63 = vmul.f32 %v1912_v29, %v618_v24  ;;  %v645_v30 = vmul.f32 %v1918_v32, %v626_v0  ;;  %v646_v11 = vmul.f32 %v1921_v33, %v630_v27 }
 0x3a5   :  { %1197 = vperm.xlu0 %1401, %v1168_v59   ;;  %662 = vperm.xlu1 %1400, %v641_v61  }
 0x3a9   :  { %1200 = vperm.xlu0 %1401, %v1169_v62   ;;  %665 = vperm.xlu1 %1400, %v642_v3  }
 0x3ad   :  { %668 = vperm.xlu1 %1400, %v643_v63  }
 0x3b1   :  { %671 = vperm.xlu1 %1400, %v644_v19  }
 0x3b5   :  { %674 = vperm.xlu1 %1400, %v645_v30  }
 0x3b9   :  { %677 = vperm.xlu1 %1400, %v646_v11  }
 0x406   :  { %v1183_v28 = vpop.permute.xlu0 %1182  ;;  %v1180_v10 = vpop.permute.xlu1 %1179 }
 0x407   :  { %v1209_v51 = vrot.slane %v1183_v28, %v1753_v21  ;;  %v1205_v31 = vrot.slane %v1180_v10, %v1753_v21 }
 0x409   :  { %v1234_v35 = vsel %vm438_vm1, %v1209_v51, %v1205_v31 }
 0x40a   :  { %v1186_v29 = vpop.permute.xlu0 %1185 }
 0x40b   :  { %v1213_v32 = vrot.slane %v1186_v29, %v1753_v21 }
 0x40d   :  { %v1235_v38 = vsel %vm440_vm2, %v1213_v32, %v1234_v35 }
 0x40e   :  { %v1189_v1 = vpop.permute.xlu0 %1188 }
 0x40f   :  { %v1217_v12 = vrot.slane %v1189_v1, %v1753_v21 }
 0x411   :  { %v1236_v6 = vsel %vm442_vm3, %v1217_v12, %v1235_v38 }
 0x412   :  { %v1192_v4 = vpop.permute.xlu0 %1191 }
 0x413   :  { %v1221_v14 = vrot.slane %v1192_v4, %v1753_v21 }
 0x415   :  { %v1237_v39 = vsel %vm444_vm4, %v1221_v14, %v1236_v6 }
 0x416   :  { %v1195_v7 = vpop.permute.xlu0 %1194 }
 0x417   :  { %v1225_v37 = vrot.slane %v1195_v7, %v1753_v21 }
 0x419   :  { %v1238_v15 = vsel %vm446_vm5, %v1225_v37, %v1237_v39 }
 0x41c   :  { %v657_v18 = vpop.permute.xlu0 %656  ;;  %v660_v25 = vpop.permute.xlu1 %659 }
 0x41d   :  { %v682_v20 = vrot.slane %v657_v18, %v1753_v21  ;;  %v686_v45 = vrot.slane %v660_v25, %v1753_v21 }
 0x41f   :  { %v711_v50 = vsel %vm438_vm1, %v686_v45, %v682_v20 }
 0x420   :  { %v1198_v33 = vpop.permute.xlu0 %1197  ;;  %v663_v43 = vpop.permute.xlu1 %662 }
 0x421   :  { %v1229_v8 = vrot.slane %v1198_v33, %v1753_v21  ;;  %v690_v47 = vrot.slane %v663_v43, %v1753_v21 }
 0x423   :  { %v1239_v42 = vsel %vm448_vm6, %v1229_v8, %v1238_v15  ;;  %v712_v13 = vsel %vm440_vm2, %v690_v47, %v711_v50 }
 0x424   :  { %v1201_v40 = vpop.permute.xlu0 %1200  ;;  %v666_v41 = vpop.permute.xlu1 %665 }
 0x425   :  { %v1233_v26 = vrot.slane %v1201_v40, %v1753_v21  ;;  %v694_v46 = vrot.slane %v666_v41, %v1753_v21 }
 0x427   :  { %v1240_v44 = vsel %vm450_vm7, %v1233_v26, %v1239_v42  ;;  %v713_v36 = vsel %vm442_vm3, %v694_v46, %v712_v13 }
 0x428   :  { %1387 = vmatmul.mubr.msk.f32.vlgmr.msra.gmra.mxu1 %vm453_vm8, %v1240_v44  ;;  %v669_v16 = vpop.permute.xlu1 %668 }
 0x429   :  { %v698_v49 = vrot.slane %v669_v16, %v1753_v21 }
 0x42b   :  { %v714_v48 = vsel %vm444_vm4, %v698_v49, %v713_v36 }
 0x42c   :  { %v672_v34 = vpop.permute.xlu1 %671 }
 0x42d   :  { %v702_v52 = vrot.slane %v672_v34, %v1753_v21 }
 0x42f   :  { %v715_v17 = vsel %vm446_vm5, %v702_v52, %v714_v48 }
 0x430   :  { %v675_v9 = vpop.permute.xlu1 %674 }
 0x431   :  { %v706_v53 = vrot.slane %v675_v9, %v1753_v21 }
 0x433   :  { %v716_v57 = vsel %vm448_vm6, %v706_v53, %v715_v17 }
 0x434   :  { %v678_v54 = vpop.permute.xlu1 %677 }
 0x435   :  { %v710_v56 = vrot.slane %v678_v54, %v1753_v21 }
 0x437   :  { %v717_v23 = vsel %vm450_vm7, %v710_v56, %v716_v57 }
 0x438   :  { %1382 = vmatmul.mubr.msk.f32.vlgmr.msra.gmra.mxu0 %vm453_vm8, %v717_v23 }
 0x4e8   :  { %v1309_v58 = vpop.f32.mrf.mxu1 }
 0x4e9   :  { %1314 = vst.msk [vmem:[#allocation10 + $0x8] sm:$0xff] %vm89_vm0, %v1309_v58 }
 0x4ea   :  { %v1388_v60 = vpop.f32.mrf.mxu1 }
 0x4f8   :  { %v786_v55 = vpop.f32.mrf.mxu0 }
 0x4f9   :  { %790 = vst.msk [vmem:[#allocation10] sm:$0xff] %vm89_vm0, %v786_v55 }
 0x4fa   :  { %v1383_v59 = vpop.f32.mrf.mxu0 }
 0x4fb   :  { %1561 = shalt.err (!%p1558_p10)
}
 0x4fc   :  { %1326 = dma.vmem_to_hbm [thread:$0]  %s1321_s13, 256, %s2035_s5, [#allocation4], %s1580_s23, %s1580_s23, %s1581_s24  }
 0x4fd   :  { %1576 = dma.done.wait [#allocation4], 256  }
 0x4fe   :  { %1577 = vsyncadd [#allocation4], 4294967040 }
 0x4ff   :  { %1330 = vsyncpa [#allocation3], 1 }
 0x500   :  { %1331 = vsyncpa [#allocation6], 1 }
 0x501   :  { %1332 = vsyncpa [#allocation9], 1 }
 0x502   :  { %1333 = vsyncpa [#allocation4], 1 }

</bundles_post_ra>
